<compile_context>
chip_gen: v7x
topology: tpu7x:2x2x1
jax: 0.10.0
libtpu: 0.0.40
codegen_flags: <defaults>
</compile_context>

<pallas_src>
import functools

import jax
import jax.numpy as jnp
from jax.experimental import pallas as pl
from jax.experimental.pallas import tpu as pltpu


def _ls_ce_kernel(logits_ref, labels_ref, out_ref, *, ignore_index,
                  need_smooth_count):
    x_in = logits_ref[...]                            # (TN, C), native dtype
    labels = labels_ref[...]                          # (TN, 1) int32
    C = x_in.shape[1]

    # Row max on the native dtype (exact for bf16/f32; halves vreg traffic for
    # bf16 transport on v6e/v7x), then f32 for everything else.
    m = jnp.max(x_in, axis=1, keepdims=True).astype(jnp.float32)   # (TN, 1)

    # Gather x[label] via one-hot compare on the native-dtype tile so the
    # iota/onehot/select temps do not coexist with the f32 shifted/exp temps.
    # (No dynamic gather on TPU.)
    col = jax.lax.broadcasted_iota(jnp.int32, x_in.shape, 1)
    onehot = col == labels                            # (TN, C) bool
    x_at_label = jnp.sum(jnp.where(onehot, x_in.astype(jnp.float32), 0.0),
                         axis=1, keepdims=True)       # (TN, 1)

    x = x_in.astype(jnp.float32)                      # (TN, C) f32
    sum_x = jnp.sum(x, axis=1, keepdims=True)         # (TN, 1)

    # Numerically stable log-sum-exp along the class axis (axis=1).
    shifted = x - m                                   # (TN, C)
    lse = jnp.log(jnp.sum(jnp.exp(shifted), axis=1, keepdims=True))  # (TN, 1)
    # TODO(synk): if bundle dumps show the VALU slot saturating on the bf16
    #             path (v6e/v7x), offload these plain lane row-sums to the
    #             idle MXU via a ones-column matmul.

    valid = (labels != ignore_index).astype(jnp.float32)            # (TN, 1)

    # nll_per    = -(logp[label])      = lse - (x[label] - m)
    # smooth_per = -mean(logp)         = lse - (sum(x)/C - m)
    nll_per = (lse + m - x_at_label) * valid                        # (TN, 1)
    smooth_per = (lse + m - sum_x * (1.0 / C)) * valid              # (TN, 1)

    nll_sum = jnp.sum(nll_per)
    n_valid = jnp.sum(valid)
    sm_sum = jnp.sum(smooth_per)
    if need_smooth_count:
        # Matches the PyTorch module: divide by count of (smooth_loss > 0).
        sm_cnt = jnp.sum((smooth_per > 0.0).astype(jnp.float32))
    else:
        sm_cnt = jnp.float32(0.0)

    # Per-tile partials in lanes 0..3 of a lane-dense (1, 1, 128) block.
    lane = jax.lax.broadcasted_iota(jnp.int32, out_ref.shape, 2)
    out_ref[...] = (jnp.where(lane == 0, nll_sum, 0.0)
                    + jnp.where(lane == 1, n_valid, 0.0)
                    + jnp.where(lane == 2, sm_sum, 0.0)
                    + jnp.where(lane == 3, sm_cnt, 0.0))


def _vmem_limit_bytes():
    """Scoped-VMEM limit sized from physical VMEM (works on v5e/v6e/v7x)."""
    try:
        cap = int(pltpu.get_tpu_info().vmem_capacity_bytes)
    except Exception:
        cap = 64 * 1024 * 1024  # conservative fallback (v7x physical)
    # ~25% headroom for compiler scratch; never ask above ~100 MiB.
    return min(int(cap * 0.75), 100 * 1024 * 1024)


def _sublane_align(dtype):
    """Sublane packing: 8 rows for 4-byte, 16 for 2-byte, 32 for 1-byte."""
    in_bytes = jnp.dtype(dtype).itemsize
    return max(8, 32 // max(in_bytes, 1))


def _pick_tile_n(n_rows, n_cols, dtype, vmem_limit):
    """Choose a row-tile sized against the VMEM budget and a DMA-byte target."""
    in_bytes = jnp.dtype(dtype).itemsize
    align = _sublane_align(dtype)
    # Per-row VMEM cost:
    #   2x double-buffered input rows of `dtype` (BlockSpec pipeline)
    #   ~5 full-width f32 in-kernel temps (x, shifted, exp(shifted), iota/onehot,
    #     masked select) -- worst-case live set, keeps v7x's 48 MiB budget honest
    #   ~1 KiB/row for the lane-padded (tile_n, 1) int32 labels (8-row group ==
    #     one 4 KiB vreg tile, x2 double buffers)
    per_row = n_cols * (2 * in_bytes + 5 * 4) + 1024
    budget = int(vmem_limit * 0.6)
    tile = budget // max(per_row, 1)
    # Bytes-per-block target instead of a fixed row cap: ~4 MiB of logits per
    # grid step keeps per-step overhead amortized even for small C.
    target_rows = (4 * 1024 * 1024) // max(n_cols * in_bytes, 1)
    tile = min(tile, max(target_rows, align))
    tile = max(align, (tile // align) * align)
    # Don't pad tiny inputs up to a huge tile.
    rounded_n = ((n_rows + align - 1) // align) * align
    return min(tile, max(align, rounded_n))


def label_smoothed_cross_entropy(logits, labels, *, epsilon=0.1,
                                 ignore_index=-100, reduction="mean",
                                 tile_n=None):
    # TODO(synk): reduction=None (per-element output) path is not implemented.
    # TODO(synk): for very large vocabularies (C >= ~16K f32 / ~32K bf16 on
    #             v7x) add a class-tiled grid axis with an online (flash-style)
    #             log-sum-exp instead of loading full (tile_n, C) row blocks.
    assert reduction in ("mean", "sum")
    N, C = logits.shape
    itemsize = jnp.dtype(logits.dtype).itemsize
    align = _sublane_align(logits.dtype)

    vmem_limit = _vmem_limit_bytes()
    if tile_n is None:
        tile_n = _pick_tile_n(N, C, logits.dtype, vmem_limit)
        # Enforce >= ~4 grid steps (when N allows): hides the prologue DMA
        # behind compute and gives both v7x TensorCores work to do.
        min_steps = 4
        cap = ((N + min_steps - 1) // min_steps + align - 1) // align * align
        tile_n = max(align, min(tile_n, cap))

    # Pad rows to a multiple of the tile; padded rows use ignore_index so they
    # contribute nothing to any partial sum.
    n_pad = (-N) % tile_n
    if n_pad:
        logits = jnp.pad(logits, ((0, n_pad), (0, 0)))
        labels = jnp.pad(labels, ((0, n_pad),), constant_values=ignore_index)
    labels2d = labels.astype(jnp.int32).reshape(-1, 1)
    n_padded = logits.shape[0]
    num_tiles = n_padded // tile_n

    need_smooth_count = (reduction == "mean") and (float(epsilon) != 0.0)
    kernel = functools.partial(
        _ls_ce_kernel,
        ignore_index=int(ignore_index),
        need_smooth_count=need_smooth_count,
    )

    cost = pl.CostEstimate(
        flops=8 * n_padded * C,
        transcendentals=n_padded * C,
        bytes_accessed=(n_padded * C * itemsize      # logits read
                        + n_padded * 4               # labels read
                        + num_tiles * 128 * 4),      # partials write
    )

    partials = pl.pallas_call(
        kernel,
        out_shape=jax.ShapeDtypeStruct((num_tiles, 1, 128), jnp.float32),
        grid_spec=pltpu.PrefetchScalarGridSpec(
            num_scalar_prefetch=0,
            grid=(num_tiles,),
            in_specs=[
                pl.BlockSpec((tile_n, C), lambda i: (i, 0)),
                pl.BlockSpec((tile_n, 1), lambda i: (i, 0)),
            ],
            out_specs=pl.BlockSpec((1, 1, 128), lambda i: (i, 0, 0)),
        ),
        compiler_params=pltpu.CompilerParams(
            dimension_semantics=("parallel",),
            vmem_limit_bytes=vmem_limit),
        cost_estimate=cost,
    )(logits, labels2d)

    # Tiny final combine in JAX (keeps the grid axis fully parallel).
    totals = jnp.sum(partials[:, 0, :], axis=0)       # (128,)
    nll_sum, n_valid, sm_sum, sm_cnt = totals[0], totals[1], totals[2], totals[3]

    if reduction == "mean":
        # Note: if every label is ignore_index this is 0/0 = NaN, matching
        # torch.nn.functional.nll_loss semantics.
        nll = nll_sum / n_valid
        smooth = sm_sum / (sm_cnt + 1e-10)
    else:  # "sum"
        nll = nll_sum
        smooth = sm_sum

    if float(epsilon) == 0.0:
        return nll
    return (1.0 - float(epsilon)) * nll + float(epsilon) * smooth


def _reference(logits, labels, epsilon=0.1, ignore_index=-100, reduction="mean"):
    # Pure-JAX reference mirroring the PyTorch module.
    logp = jax.nn.log_softmax(logits.astype(jnp.float32), axis=1)
    valid = labels != ignore_index
    safe = jnp.where(valid, labels, 0)
    nll_per = -jnp.take_along_axis(logp, safe[:, None], axis=1)[:, 0]
    nll_per = jnp.where(valid, nll_per, 0.0)
    smooth_per = jnp.where(valid, -jnp.mean(logp, axis=1), 0.0)
    if reduction == "mean":
        nll = jnp.sum(nll_per) / jnp.sum(valid)
        smooth = jnp.sum(smooth_per) / (jnp.sum(smooth_per > 0).astype(jnp.float32) + 1e-10)
    else:
        nll = jnp.sum(nll_per)
        smooth = jnp.sum(smooth_per)
    if epsilon == 0.0:
        return nll
    return (1.0 - epsilon) * nll + epsilon * smooth


if __name__ == "__main__":
    key = jax.random.PRNGKey(0)
    N, C = 16, 32
    k_logits, k_labels = jax.random.split(key)

    logits = jax.random.normal(k_logits, (N, C), dtype=jnp.float32)
    labels = jax.random.randint(k_labels, (N,), 0, C).astype(jnp.int32)
    # Mark a couple of positions as ignored to exercise the ignore_index path.
    labels = labels.at[3].set(-100).at[7].set(-100)

    # f32, reduction='mean'
    loss = jax.block_until_ready(
        label_smoothed_cross_entropy(logits, labels, epsilon=0.1,
                                     ignore_index=-100, reduction="mean"))
    exp = _reference(logits, labels, epsilon=0.1, reduction="mean")
    assert jnp.allclose(loss, exp, rtol=1e-5, atol=1e-5), (loss, exp)

    # f32, reduction='sum'
    loss_s = jax.block_until_ready(
        label_smoothed_cross_entropy(logits, labels, epsilon=0.1,
                                     ignore_index=-100, reduction="sum"))
    exp_s = _reference(logits, labels, epsilon=0.1, reduction="sum")
    assert jnp.allclose(loss_s, exp_s, rtol=1e-5, atol=1e-5), (loss_s, exp_s)

    # epsilon=0 path (pure NLL)
    loss_e0 = jax.block_until_ready(
        label_smoothed_cross_entropy(logits, labels, epsilon=0.0,
                                     ignore_index=-100, reduction="mean"))
    exp_e0 = _reference(logits, labels, epsilon=0.0, reduction="mean")
    assert jnp.allclose(loss_e0, exp_e0, rtol=1e-5, atol=1e-5), (loss_e0, exp_e0)

    # bf16 transport (kernel casts to f32 internally)
    logits_bf16 = logits.astype(jnp.bfloat16)
    loss_bf = jax.block_until_ready(
        label_smoothed_cross_entropy(logits_bf16, labels, epsilon=0.1,
                                     ignore_index=-100, reduction="mean"))
    exp_bf = _reference(logits_bf16.astype(jnp.float32), labels,
                        epsilon=0.1, reduction="mean")
    assert jnp.allclose(loss_bf, exp_bf, rtol=1e-4, atol=1e-4), (loss_bf, exp_bf)

    print("KERNEL_OK")
</pallas_src>

<mosaic_0001>
module attributes {stable_mosaic.version = 11 : i64} {
  func.func @_ls_ce_kernel(%arg0: i32, %arg1: memref<8x32xf32, #tpu.memory_space<vmem>>, %arg2: memref<8x1xi32, #tpu.memory_space<vmem>>, %arg3: memref<1x1x128xf32, #tpu.memory_space<vmem>>) attributes {dimension_semantics = [#tpu.dimension_semantics<parallel>], iteration_bounds = array<i64: 2>, scalar_prefetch = 0 : i64, scratch_operands = 0 : i64, tpu.core_type = #tpu.core_type<tc>, window_params = [{transform_indices = @transform_0, window_bounds = array<i64: 8, 32>}, {transform_indices = @transform_1, window_bounds = array<i64: 8, 1>}, {transform_indices = @transform_2, window_bounds = array<i64: 1, 1, 128>}]} {
    %c0 = arith.constant 0 : index
    %c0_0 = arith.constant 0 : index
    %0 = vector.load %arg1[%c0, %c0_0] : memref<8x32xf32, #tpu.memory_space<vmem>>, vector<8x32xf32>
    %c0_1 = arith.constant 0 : index
    %c0_2 = arith.constant 0 : index
    %1 = vector.load %arg2[%c0_1, %c0_2] : memref<8x1xi32, #tpu.memory_space<vmem>>, vector<8x1xi32>
    %cst = arith.constant dense<0xFF800000> : vector<8xf32>
    %2 = vector.multi_reduction <maximumf>, %0, %cst [1] : vector<8x32xf32> to vector<8xf32>
    %3 = vector.shape_cast %2 : vector<8xf32> to vector<8x1xf32>
    %4 = tpu.iota {dimensions = array<i32: 1>} : vector<8x32xi32>
    %5 = vector.broadcast %1 : vector<8x1xi32> to vector<8x32xi32>
    %6 = arith.cmpi eq, %4, %5 : vector<8x32xi32>
    %cst_3 = arith.constant 0.000000e+00 : f32
    %7 = vector.broadcast %cst_3 : f32 to vector<8x32xf32>
    %8 = arith.select %6, %0, %7 : vector<8x32xi1>, vector<8x32xf32>
    %cst_4 = arith.constant dense<0.000000e+00> : vector<8xf32>
    %9 = vector.multi_reduction <add>, %8, %cst_4 [1] : vector<8x32xf32> to vector<8xf32>
    %10 = vector.shape_cast %9 : vector<8xf32> to vector<8x1xf32>
    %cst_5 = arith.constant dense<0.000000e+00> : vector<8xf32>
    %11 = vector.multi_reduction <add>, %0, %cst_5 [1] : vector<8x32xf32> to vector<8xf32>
    %12 = vector.shape_cast %11 : vector<8xf32> to vector<8x1xf32>
    %13 = vector.broadcast %3 : vector<8x1xf32> to vector<8x32xf32>
    %14 = arith.subf %0, %13 : vector<8x32xf32>
    %15 = math.exp %14 : vector<8x32xf32>
    %cst_6 = arith.constant dense<0.000000e+00> : vector<8xf32>
    %16 = vector.multi_reduction <add>, %15, %cst_6 [1] : vector<8x32xf32> to vector<8xf32>
    %17 = vector.shape_cast %16 : vector<8xf32> to vector<8x1xf32>
    %18 = math.log %17 : vector<8x1xf32>
    %c-100_i32 = arith.constant -100 : i32
    %19 = vector.broadcast %c-100_i32 : i32 to vector<8x1xi32>
    %20 = arith.cmpi ne, %1, %19 : vector<8x1xi32>
    %21 = arith.extui %20 : vector<8x1xi1> to vector<8x1xi32>
    %22 = arith.sitofp %21 : vector<8x1xi32> to vector<8x1xf32>
    %23 = arith.addf %18, %3 : vector<8x1xf32>
    %24 = arith.subf %23, %10 : vector<8x1xf32>
    %25 = arith.mulf %24, %22 : vector<8x1xf32>
    %26 = arith.addf %18, %3 : vector<8x1xf32>
    %cst_7 = arith.constant 3.125000e-02 : f32
    %27 = vector.broadcast %cst_7 : f32 to vector<8x1xf32>
    %28 = arith.mulf %12, %27 : vector<8x1xf32>
    %29 = arith.subf %26, %28 : vector<8x1xf32>
    %30 = arith.mulf %29, %22 : vector<8x1xf32>
    %31 = vector.shape_cast %25 : vector<8x1xf32> to vector<1x8x1xf32>
    %cst_8 = arith.constant dense<0.000000e+00> : vector<1xf32>
    %32 = vector.multi_reduction <add>, %31, %cst_8 [1, 2] : vector<1x8x1xf32> to vector<1xf32>
    %33 = vector.shape_cast %32 : vector<1xf32> to vector<1x1x1xf32>
    %34 = vector.extract %33[0, 0, 0] : f32 from vector<1x1x1xf32>
    %35 = vector.shape_cast %22 : vector<8x1xf32> to vector<1x8x1xf32>
    %cst_9 = arith.constant dense<0.000000e+00> : vector<1xf32>
    %36 = vector.multi_reduction <add>, %35, %cst_9 [1, 2] : vector<1x8x1xf32> to vector<1xf32>
    %37 = vector.shape_cast %36 : vector<1xf32> to vector<1x1x1xf32>
    %38 = vector.extract %37[0, 0, 0] : f32 from vector<1x1x1xf32>
    %39 = vector.shape_cast %30 : vector<8x1xf32> to vector<1x8x1xf32>
    %cst_10 = arith.constant dense<0.000000e+00> : vector<1xf32>
    %40 = vector.multi_reduction <add>, %39, %cst_10 [1, 2] : vector<1x8x1xf32> to vector<1xf32>
    %41 = vector.shape_cast %40 : vector<1xf32> to vector<1x1x1xf32>
    %42 = vector.extract %41[0, 0, 0] : f32 from vector<1x1x1xf32>
    %cst_11 = arith.constant 0.000000e+00 : f32
    %43 = vector.broadcast %cst_11 : f32 to vector<8x1xf32>
    %44 = arith.cmpf ogt, %30, %43 : vector<8x1xf32>
    %45 = arith.extui %44 : vector<8x1xi1> to vector<8x1xi32>
    %46 = arith.sitofp %45 : vector<8x1xi32> to vector<8x1xf32>
    %47 = vector.shape_cast %46 : vector<8x1xf32> to vector<1x8x1xf32>
    %cst_12 = arith.constant dense<0.000000e+00> : vector<1xf32>
    %48 = vector.multi_reduction <add>, %47, %cst_12 [1, 2] : vector<1x8x1xf32> to vector<1xf32>
    %49 = vector.shape_cast %48 : vector<1xf32> to vector<1x1x1xf32>
    %50 = vector.extract %49[0, 0, 0] : f32 from vector<1x1x1xf32>
    %51 = tpu.iota {dimensions = array<i32: 2>} : vector<1x1x128xi32>
    %c0_i32 = arith.constant 0 : i32
    %52 = vector.broadcast %c0_i32 : i32 to vector<1x1x128xi32>
    %53 = arith.cmpi eq, %51, %52 : vector<1x1x128xi32>
    %cst_13 = arith.constant 0.000000e+00 : f32
    %54 = vector.broadcast %34 : f32 to vector<1x1x128xf32>
    %55 = vector.broadcast %cst_13 : f32 to vector<1x1x128xf32>
    %56 = arith.select %53, %54, %55 : vector<1x1x128xi1>, vector<1x1x128xf32>
    %c1_i32 = arith.constant 1 : i32
    %57 = vector.broadcast %c1_i32 : i32 to vector<1x1x128xi32>
    %58 = arith.cmpi eq, %51, %57 : vector<1x1x128xi32>
    %cst_14 = arith.constant 0.000000e+00 : f32
    %59 = vector.broadcast %38 : f32 to vector<1x1x128xf32>
    %60 = vector.broadcast %cst_14 : f32 to vector<1x1x128xf32>
    %61 = arith.select %58, %59, %60 : vector<1x1x128xi1>, vector<1x1x128xf32>
    %62 = arith.addf %56, %61 : vector<1x1x128xf32>
    %c2_i32 = arith.constant 2 : i32
    %63 = vector.broadcast %c2_i32 : i32 to vector<1x1x128xi32>
    %64 = arith.cmpi eq, %51, %63 : vector<1x1x128xi32>
    %cst_15 = arith.constant 0.000000e+00 : f32
    %65 = vector.broadcast %42 : f32 to vector<1x1x128xf32>
    %66 = vector.broadcast %cst_15 : f32 to vector<1x1x128xf32>
    %67 = arith.select %64, %65, %66 : vector<1x1x128xi1>, vector<1x1x128xf32>
    %68 = arith.addf %62, %67 : vector<1x1x128xf32>
    %c3_i32 = arith.constant 3 : i32
    %69 = vector.broadcast %c3_i32 : i32 to vector<1x1x128xi32>
    %70 = arith.cmpi eq, %51, %69 : vector<1x1x128xi32>
    %cst_16 = arith.constant 0.000000e+00 : f32
    %71 = vector.broadcast %50 : f32 to vector<1x1x128xf32>
    %72 = vector.broadcast %cst_16 : f32 to vector<1x1x128xf32>
    %73 = arith.select %70, %71, %72 : vector<1x1x128xi1>, vector<1x1x128xf32>
    %74 = arith.addf %68, %73 : vector<1x1x128xf32>
    %c0_17 = arith.constant 0 : index
    %c0_18 = arith.constant 0 : index
    %c0_19 = arith.constant 0 : index
    %75 = vector.load %arg3[%c0_17, %c0_18, %c0_19] : memref<1x1x128xf32, #tpu.memory_space<vmem>>, vector<1x1x128xf32>
    tpu.vector_store %arg3[%c0_17, %c0_18, %c0_19], %74 {strides = array<i32>} : memref<1x1x128xf32, #tpu.memory_space<vmem>>, vector<1x1x128xf32>,
    return
  }
  func.func @transform_0(%arg0: i32) -> (i32, i32) {
    %c0_i32 = arith.constant 0 : i32
    %c0_i32_0 = arith.constant 0 : i32
    return %arg0, %c0_i32 : i32, i32
  }
  func.func @transform_1(%arg0: i32) -> (i32, i32) {
    %c0_i32 = arith.constant 0 : i32
    %c0_i32_0 = arith.constant 0 : i32
    return %arg0, %c0_i32 : i32, i32
  }
  func.func @transform_2(%arg0: i32) -> (i32, i32, i32) {
    %c0_i32 = arith.constant 0 : i32
    %c0_i32_0 = arith.constant 0 : i32
    %c0_i32_1 = arith.constant 0 : i32
    return %arg0, %c0_i32, %c0_i32_0 : i32, i32, i32
  }
}

</mosaic_0001>

<bundles_post_ra>
// kernel: tpu_custom_call.1
= control target key start
LH: loop header
LB: loop body
LE: loop exit
PB: predicated region body
PF: predicated region fallthrough
CT: control target
= control target key end

     0   :  { %7 = vsyncpa [#allocation3], 0  ;;  %s596_s0 = inlined_call_operand.vmem [shape: f32[16,32], index: 0, kind: input, shape index: {}]   ;;  %s597_s1 = inlined_call_operand.vmem [shape: s32[16,1], index: 1, kind: input, shape index: {}]   ;;  %s598_s2 = inlined_call_operand.hbm [shape: f32[2,1,128], index: 2, kind: output, shape index: {}]  }
   0x1   :  { %9 = vsyncpa [#allocation3 + $0x1], 0  ;;  %s478_s9 = smov 0   ;;  %s480_s10 = smov 0  }
   0x2   :  { %s482_s11 = smov 0   ;;  %s484_s12 = smov 0  }
   0x3 LB: > { %s499_s13 = sadd.s32 4294967295, %s458_s12   ;;  %s331_s14 = sadd.s32 4294967294, %s458_s12   ;;  %s458_s12 = sphi %s484_s12, %s604_s12   ;;  %s454_s11 = sphi %s482_s11, %s603_s11   ;;  %s450_s10 = sphi %s480_s10, %s602_s10   ;;  %s446_s9 = sphi %s478_s9, %s601_s9  }
   0x4   : > { %s503_s15 = sadd.s32 1, %s458_s12   ;;  %s74_s16 = sadd.s32 1, %s454_s11 }
   0x5   : > { %s71_s17 = ssub.s32 %s458_s12, %s503_s15  ;;  %p84_p0 = scmp.ne.s32.totalorder %s454_s11, %s450_s10 }
   0x6   : > { %p72_p1 = scmp.eq.s32.totalorder %s71_s17, 0  ;;  %p85_p2 = scmp.eq.s32.totalorder %s499_s13, 1 }
   0x7   : > { %p90_p3 = scmp.ne.s32.totalorder %s450_s10, %s446_s9  ;;  %p91_p4 = scmp.eq.s32.totalorder %s331_s14, 1 }
   0x8   : > { %s514_s18 = scalar_select %p72_p1, %s454_s11, %s74_s16  }
   0x9   : > { %p516_p5 = por %p85_p2, %p84_p0  ;;  %p520_p6 = por %p91_p4, %p90_p3 }
   0xa   : > { %p334_p7 = scmp.ge.s32.totalorder %s458_s12, 1  ;;  %p123_p8 = scmp.lt.s32.totalorder %s458_s12, 3 }
   0xc   : > { %p124_p9 = pnand %p334_p7, %p123_p8 }
   0xd   : > { %p147_p10 = scmp.lt.s32.totalorder (!%p124_p9), %s499_s13, 1  ;;  %v460_v0 = vmov (!%p124_p9), 0   ;;  %vm157_vm0 = vcmask (!%p124_p9), 261120   ;;  %v161_v7 = vlaneseq (!%p124_p9)  ;;  %v461_v15 = vmov (!%p124_p9), 0.0   ;;  %s145_s3 = sand.u32 (!%p124_p9), 1, %s450_s10  }
   0xe   : > { %127 = sbr.rel (%p124_p9) target bundleno = 577 (0x241), region = 28  ;;  %391 = vset.pattern.permute.xlu0 (!%p124_p9), %v460_v0  ;;  %vm191_vm3 = vcmask (!%p124_p9), 7168   ;;  %s339_s5 = sshll.u32 (!%p124_p9), %s499_s13, 4 }
   0xf   : > { %v535_v8 = vand.u32 (!%p124_p9), 127, %v161_v7  ;;  %s146_s7 = scalar_lea.vmem (!%p124_p9), [#allocation2], %s145_s3  ;;  %s554_s17 = scalar_lea.hbm (!%p124_p9), %s598_s2, %s339_s5 }
  0x10   : > { %s264_s8 = sshll.u32 (!%p124_p9), %s146_s7, 4  ;;  %s556_s8 = int_to_ptr.vmem [resolvable:$true] %s264_s8 }
  0x11   : > { %vm235_vm5 = vcmp.eq.s32.totalorder (!%p124_p9), %v535_v8, 0  ;;  %vm238_vm6 = vcmp.eq.s32.totalorder (!%p124_p9), %v535_v8, 1  ;;  %vm242_vm7 = vcmp.eq.s32.totalorder (!%p124_p9), %v535_v8, 2  ;;  %vm246_vm8 = vcmp.eq.s32.totalorder (!%p124_p9), %v535_v8, 3 }
  0x15   : > { %s148_s21 = scalar_select %p147_p10, %s499_s13, 1 }
  0x16   : > { %s396_s13 = scalar_lea.vmem %s556_s8, 16 }
  0x17   : > { %s335_s22 = sshll.u32 %s148_s21, 3  ;;  %s252_s21 = scalar_lea.sflag [#allocation3], %s145_s3 }
  0x18   : > { %s150_s25 = scalar_lea.vmem %s596_s0, %s335_s22  ;;  %s154_s28 = scalar_lea.vmem %s597_s1, %s335_s22 }
  0x19   : > { %v155_v1 = vld [vmem:[%s150_s25] sm:$0xff]  ;;  %p397_p11 = scmp.ne.s32.totalorder %s556_s8, %s396_s13  ;;  %s462_s22 = smov [#allocation2]  }
  0x1a   : > { %v158_v2 = vsel %vm157_vm0, %v155_v1, -inf  ;;  %v156_v3 = vld [vmem:[%s154_s28] sm:$0xff]  ;;  %v171_v14 = vsel %vm157_vm0, %v155_v1, 0.0  ;;  %s400_s23 = sshll.u32 %s462_s22, 4  ;;  %s401_s23 = int_to_ptr.vmem [resolvable:$false] %s400_s23 }
  0x1b   : > { %159 = vmax.xlane.f32.xlu0 %v158_v2  ;;  %vm182_vm2 = vcmp.ne.s32.totalorder %v156_v3, 4294967196  ;;  %p398_p12 = pnand %p397_p11, %p516_p5  ;;  %s402_s24 = scalar_lea.vmem %s401_s23, 32 }
  0x1c   : > { %v337_v16 = vsel %vm182_vm2, 1.0, %v461_v15  ;;  %p403_p0 = scmp.lt.s32.totalorder %s556_s8, %s401_s23  ;;  %p404_p1 = scmp.lt.s32.totalorder %s402_s24, %s396_s13 }
  0x1d   : > { %v202_v17 = vsel %vm191_vm3, %v337_v16, 0.0  ;;  %p399_p13 = pneg %p398_p12 }
  0x1e   : > { %p405_p2 = por %p404_p1, %p403_p0 }
  0x20   : > { %p406_p3 = pnand %p405_p2, %p399_p13 }
  0x31   : > { %164 = vperm.xlu0 %391, %v156_v3  }
  0xa8   : > { %v160_v4 = vpop.xlane.xlu0 %159 }
  0xa9   : > { %v174_v5 = vsub.f32 %v155_v1, %v160_v4 }
  0xab   : > { %v175_v6 = vmul.f32 1.442695, %v174_v5 }
  0xad   : > { %392 = vpow2.f32 %v175_v6 }
  0xb0   : > { %v165_v9 = vpop.permute.xlu0 %164 }
  0xb1   : > { %vm166_vm1 = vcmp.eq.s32.totalorder %v535_v8, %v165_v9 }
  0xb2   : > { %v167_v11 = vsel %vm166_vm1, %v155_v1, 0.0 }
  0xb3   : > { %v168_v13 = vsel %vm157_vm0, %v167_v11, 0.0 }
  0xb7   : > { %v393_v10 = vpop.eup %392 }
  0xb8   : > { %v177_v12 = vsel %vm157_vm0, %v393_v10, 0.0 }
  0xb9   : > { %178 = vadd.xlane.f32.xlu1 %v177_v12 }
  0xbd   : > { %169 = vadd.xlane.f32.xlu1 %v168_v13 }
  0xc1   : > { %172 = vadd.xlane.f32.xlu1 %v171_v14 }
  0xc5   : > { %203 = vadd.xlane.f32.xlu1 %v202_v17 }
 0x146   : > { %v179_v18 = vpop.xlane.xlu1 %178 }
 0x147   : > { %394 = vlog2.f32 %v179_v18 }
 0x14a   : > { %v170_v19 = vpop.xlane.xlu1 %169 }
 0x14e   : > { %v173_v20 = vpop.xlane.xlu1 %172 }
 0x14f   : > { %v188_v23 = vmul.f32 0.03125, %v173_v20 }
 0x151   : > { %v395_v21 = vpop.eup %394 }
 0x152   : > { %v181_v22 = vmul.f32 0.6931472, %v395_v21  ;;  %v204_v33 = vpop.xlane.xlu1 %203 }
 0x153   : > { %v205_v34 = vrot.slane %v204_v33, 4 }
 0x154   : > { %v185_v24 = vadd.f32 %v181_v22, %v160_v4 }
 0x155   : > { %v206_v35 = vadd.f32 %v205_v34, %v204_v33 }
 0x156   : > { %v186_v25 = vsub.f32 %v185_v24, %v170_v19  ;;  %v189_v26 = vsub.f32 %v185_v24, %v188_v23 }
 0x157   : > { %v207_v36 = vrot.slane %v206_v35, 2 }
 0x158   : > { %v187_v27 = vmul.f32 %v337_v16, %v186_v25  ;;  %v190_v28 = vmul.f32 %v337_v16, %v189_v26 }
 0x159   : > { %v208_v41 = vadd.f32 %v207_v36, %v206_v35 }
 0x15a   : > { %v192_v29 = vsel %vm191_vm3, %v187_v27, 0.0  ;;  %vm222_vm4 = vcmp.gt.f32.partialorder %v190_v28, 0.0  ;;  %v212_v30 = vsel %vm191_vm3, %v190_v28, 0.0 }
 0x15b   : > { %193 = vadd.xlane.f32.xlu1 %v192_v29  ;;  %v338_v31 = vsel %vm222_vm4, 1.0, %v461_v15  ;;  %v209_v47 = vrot.slane %v208_v41, 1 }
 0x15c   : > { %v225_v32 = vsel %vm191_vm3, %v338_v31, 0.0 }
 0x15d   : > { %v210_v54 = vadd.f32 %v209_v47, %v208_v41 }
 0x15f   : > { %213 = vadd.xlane.f32.xlu1 %v212_v30 }
 0x163   : > { %226 = vadd.xlane.f32.xlu1 %v225_v32 }
 0x1e8   : > { %v194_v37 = vpop.xlane.xlu1 %193 }
 0x1e9   : > { %v195_v38 = vrot.slane %v194_v37, 4 }
 0x1eb   : > { %v196_v39 = vadd.f32 %v195_v38, %v194_v37 }
 0x1ec   : > { %v214_v40 = vpop.xlane.xlu1 %213 }
 0x1ed   : > { %v197_v42 = vrot.slane %v196_v39, 2  ;;  %v215_v43 = vrot.slane %v214_v40, 4 }
 0x1ef   : > { %v216_v44 = vadd.f32 %v215_v43, %v214_v40  ;;  %v198_v45 = vadd.f32 %v197_v42, %v196_v39 }
 0x1f0   : > { %v227_v46 = vpop.xlane.xlu1 %226 }
 0x1f1   : > { %v217_v48 = vrot.slane %v216_v44, 2  ;;  %v228_v49 = vrot.slane %v227_v46, 4  ;;  %v199_v50 = vrot.slane %v198_v45, 1 }
 0x1f3   : > { %v229_v51 = vadd.f32 %v228_v49, %v227_v46  ;;  %v200_v52 = vadd.f32 %v199_v50, %v198_v45  ;;  %v218_v53 = vadd.f32 %v217_v48, %v216_v44 }
 0x1f5   : > { %v230_v55 = vrot.slane %v229_v51, 2  ;;  %342 = vpush %v200_v52  ;;  %v219_v56 = vrot.slane %v218_v53, 1 }
 0x1f6   : > { %344 = vpush %v210_v54 }
 0x1f7   : > { %v231_v57 = vadd.f32 %v230_v55, %v229_v51  ;;  %v220_v58 = vadd.f32 %v219_v56, %v218_v53 }
 0x1f9   : > { %346 = vpush %v220_v58  ;;  %v232_v59 = vrot.slane %v231_v57, 1 }
 0x1fb   : > { %v233_v60 = vadd.f32 %v232_v59, %v231_v57 }
 0x1fd   : > { %348 = vpush %v233_v60 }
 0x226   : > { %s343_s29 = spop %342 }
 0x227   : > { %v236_v61 = vstv %s343_s29  ;;  %s345_s30 = spop %344 }
 0x228   : > { %v239_v62 = vstv %s345_s30  ;;  %v237_v63 = vsel %vm235_vm5, %v236_v61, 0.0 }
 0x229   : > { %v240_v0 = vsel %vm238_vm6, %v239_v62, 0.0 }
 0x22a   : > { %s347_s4 = spop %346  ;;  %v241_v3 = vadd.f32 %v240_v0, %v237_v63 }
 0x22b   : > { %v243_v1 = vstv %s347_s4 }
 0x22c   : > { %v244_v2 = vsel %vm242_vm7, %v243_v1, 0.0 }
 0x22d   : > { %v245_v4 = vadd.f32 %v244_v2, %v241_v3 }
 0x22e   : > { %s349_s6 = spop %348 }
 0x22f   : > { %v247_v5 = vstv %s349_s6 }
 0x230   : > { %v248_v6 = vsel %vm246_vm8, %v247_v5, 0.0 }
 0x231   : > { %v249_v7 = vadd.f32 %v248_v6, %v245_v4 }
 0x233   : > { %250 = vst [vmem:[%s146_s7] sm:$0x1] %v249_v7 }
 0x234   : > { %409 = shalt.err (!%p406_p3)
}
 0x235   : > { %s410_s25 = scalar_lea.hbm %s554_s17, 16  ;;  %s414_s28 = scalar_lea.hbm %s598_s2, 32 }
 0x236   : > { %p411_p4 = scmp.ne.s32.totalorder %s554_s17, %s410_s25  ;;  %p415_p9 = scmp.lt.u32.totalorder %s554_s17, %s598_s2 }
 0x237   : > { %p416_p10 = scmp.lt.u32.totalorder %s414_s28, %s410_s25  ;;  %p418_p12 = scmp.lt.u32.totalorder %s410_s25, %s554_s17 }
 0x238   : > { %p412_p7 = pnand %p411_p4, %p516_p5 }
 0x239   : > { %p417_p11 = por %p416_p10, %p415_p9 }
 0x23a   : > { %p413_p8 = pneg %p412_p7 }
 0x23b   : > { %p419_p13 = por %p418_p12, %p417_p11 }
 0x23d   : > { %p420_p0 = pnand %p419_p13, %p413_p8 }
 0x23f   : > { %423 = shalt.err (!%p420_p0)
}
 0x240   : > { %350 = dma.vmem_to_hbm [thread:$0]  (%p516_p5), %s556_s8, 16, %s554_s17, %s252_s21  }
 0x241 PF: > { %p356_p1 = scmp.ge.s32.totalorder %s458_s12, 2  ;;  %s276_s3 = sand.u32 1, %s446_s9  }
 0x242   : > { %s277_s4 = scalar_lea.sflag [#allocation3], %s276_s3 }
 0x243   : > { %p353_p2 = pnand %p356_p1, %p520_p6 }
 0x245   : > { %441 = dma.done.wait (!%p353_p2), %s277_s4, 16  }
 0x246   : > { %443 = vsyncadd (!%p353_p2), %s277_s4, 4294967280  ;;  %p12_p3 = scmp.ge.s32.totalorder %s503_s15, 4   ;;  %s601_s9 = smov %s450_s10 }
 0x247   : > { %s602_s10 = smov %s454_s11  ;;  %s603_s11 = smov %s514_s18 }
 0x248   : > { %s604_s12 = smov %s503_s15  ;;  %14 = sbr.rel (!%p12_p3) target bundleno = 3 (0x3), region = 66 }
 0x24f   :  { %281 = vsyncpa [#allocation3], 1 }
 0x250   :  { %283 = vsyncpa [#allocation3 + $0x1], 1 }

</bundles_post_ra>
